<compile_context>
chip_gen: v7x
topology: tpu7x:2x2x1
jax: 0.10.0
libtpu: 0.0.40
codegen_flags: <defaults>
</compile_context>

<pallas_src>
import functools

import jax
import jax.numpy as jnp
from jax.experimental import pallas as pl
from jax.experimental.pallas import tpu as pltpu


def _gather_kernel(ids_ref, w_ref, out_ref, *, rows, pack):
    """Gather `rows * pack` embedding rows for this grid step.

    ids_ref : SMEM (T_pad,) int32      -- scalar-prefetched flat token ids
    w_ref   : VMEM (V, E)              -- full embedding table (VMEM resident)
    out_ref : VMEM (rows, pack * E)    -- lane-dense packed output block
    """
    base = pl.program_id(0) * rows * pack
    for r in range(rows):                               # static unroll
        pieces = []
        for p in range(pack):
            tid = ids_ref[base + r * pack + p]          # SMEM scalar read
            pieces.append(w_ref[pl.ds(tid, 1), :])      # (1, E) dynamic row load
        row = pieces[0] if pack == 1 else jnp.concatenate(pieces, axis=1)
        out_ref[pl.ds(r, 1), :] = row                   # full-lane store


def embedding_forward_full(inputs, weight, *, padding_idx=0, tile_rows=8):
    """Jittable core: full (B, S, E) embeddings + lengths + masks."""
    B, S = inputs.shape
    V, E = weight.shape
    T = B * S

    # Pack several tokens per output row so stores (and the writeback slab)
    # are >=128 lanes wide even for small E.  pack == 1 when E >= 128.
    pack = 128 // E if (E < 128 and 128 % E == 0) else 1
    tile_t = tile_rows * pack                           # tokens per grid step
    T_pad = pl.cdiv(T, tile_t) * tile_t                 # static

    ids = inputs.astype(jnp.int32)

    # mask / lengths: trivial elementwise + reduce -> leave to XLA (fused).
    masks = ids != padding_idx
    lengths = masks.sum(axis=-1).astype(jnp.int32)

    # PyTorch raises on out-of-range ids; Pallas VMEM reads are unchecked, so
    # clamp defensively instead of risking an OOB read.
    ids_flat = jnp.clip(ids.reshape(T), 0, V - 1)
    if T_pad != T:
        pad = jnp.full((T_pad - T,), padding_idx, dtype=jnp.int32)
        ids_flat = jnp.concatenate([ids_flat, pad])

    grid = (T_pad // tile_t,)
    # Packed view: (T_pad // pack, pack*E) is bit-identical to (T_pad, E).
    out_shape = jax.ShapeDtypeStruct((T_pad // pack, pack * E), weight.dtype)

    emb_packed = pl.pallas_call(
        functools.partial(_gather_kernel, rows=tile_rows, pack=pack),
        out_shape=out_shape,
        grid_spec=pltpu.PrefetchScalarGridSpec(
            num_scalar_prefetch=1,                      # ids -> SMEM
            grid=grid,
            in_specs=[
                # Whole (small) table resident in VMEM; constant block index
                # so it is not re-fetched across grid steps.
                pl.BlockSpec((V, E), lambda i, ids_ref: (0, 0)),
            ],
            out_specs=pl.BlockSpec(
                (tile_rows, pack * E), lambda i, ids_ref: (i, 0)
            ),
        ),
        compiler_params=pltpu.CompilerParams(
            dimension_semantics=("parallel",),          # token tiles independent
        ),
    )(ids_flat, weight)

    emb_full = emb_packed.reshape(T_pad, E)[:T].reshape(B, S, E)
    # Dropout: identity in eval mode (see TODO at top for training mode).
    return emb_full, lengths, masks


_embedding_forward_full_jit = jax.jit(
    embedding_forward_full, static_argnames=("padding_idx", "tile_rows")
)


def embedding_forward(inputs, weight, padding_idx=0):
    """Mirrors Embedding.forward (eval mode), incl. [:, :lengths.max()]."""
    emb_full, lengths, masks = _embedding_forward_full_jit(
        inputs, weight, padding_idx=padding_idx
    )
    # Data-dependent truncation needs a concrete bound; single host sync,
    # outside the jitted/kernel hot path.
    max_len = int(lengths.max())
    return emb_full[:, :max_len], lengths, masks[:, :max_len]


if __name__ == "__main__":
    B, S, V, E = 2, 8, 16, 32
    padding_idx = 0

    key = jax.random.PRNGKey(0)
    k_w, k_ids = jax.random.split(key)

    # Embedding table; row `padding_idx` zeroed (nn.Embedding padding_idx semantics).
    weight = jax.random.normal(k_w, (V, E), dtype=jnp.float32)
    weight = weight.at[padding_idx].set(0.0)

    # Token ids in [1, V), with trailing padding zeros per row (deterministic).
    ids = jax.random.randint(k_ids, (B, S), 1, V, dtype=jnp.int32)
    ids = ids.at[0, 6:].set(padding_idx)   # row 0: length 6
    ids = ids.at[1, 5:].set(padding_idx)   # row 1: length 5

    emb_out, lengths, masks = embedding_forward(ids, weight, padding_idx)
    jax.block_until_ready((emb_out, lengths, masks))

    # Pure-JAX reference check (gather + mask/lengths + truncation).
    ref_emb = jnp.take(weight, ids, axis=0)
    ref_mask = ids != padding_idx
    ref_len = ref_mask.sum(axis=-1).astype(jnp.int32)
    max_len = int(ref_len.max())
    assert emb_out.shape == (B, max_len, E)
    assert jnp.allclose(emb_out, ref_emb[:, :max_len], atol=1e-6)
    assert jnp.array_equal(lengths, ref_len)
    assert jnp.array_equal(masks, ref_mask[:, :max_len])

    print("KERNEL_OK")
</pallas_src>

<mosaic_0001>
module attributes {stable_mosaic.version = 11 : i64} {
  func.func @_gather_kernel(%arg0: i32, %arg1: memref<32xi32, #tpu.memory_space<smem>>, %arg2: memref<16x32xf32, #tpu.memory_space<vmem>>, %arg3: memref<8x128xf32, #tpu.memory_space<vmem>>) attributes {dimension_semantics = [#tpu.dimension_semantics<parallel>], iteration_bounds = array<i64: 1>, scalar_prefetch = 1 : i64, scratch_operands = 0 : i64, tpu.core_type = #tpu.core_type<tc>, window_params = [{pipeline_mode = #tpu.pipeline_mode<synchronous>, transform_indices = @transform_0, window_bounds = array<i64: 16, 32>}, {transform_indices = @transform_1, window_bounds = array<i64: 8, 128>}]} {
    %c8_i32 = arith.constant 8 : i32
    %0 = arith.muli %arg0, %c8_i32 : i32
    %c4_i32 = arith.constant 4 : i32
    %1 = arith.muli %0, %c4_i32 : i32
    %c0_i32 = arith.constant 0 : i32
    %2 = arith.addi %1, %c0_i32 : i32
    %c0_i32_0 = arith.constant 0 : i32
    %3 = arith.addi %2, %c0_i32_0 : i32
    %4 = arith.index_cast %3 : i32 to index
    %5 = memref.load %arg1[%4] : memref<32xi32, #tpu.memory_space<smem>>
    %6 = arith.index_cast %5 : i32 to index
    %c0 = arith.constant 0 : index
    %7 = vector.load %arg2[%6, %c0] : memref<16x32xf32, #tpu.memory_space<vmem>>, vector<1x32xf32>
    %c0_i32_1 = arith.constant 0 : i32
    %8 = arith.addi %1, %c0_i32_1 : i32
    %c1_i32 = arith.constant 1 : i32
    %9 = arith.addi %8, %c1_i32 : i32
    %10 = arith.index_cast %9 : i32 to index
    %11 = memref.load %arg1[%10] : memref<32xi32, #tpu.memory_space<smem>>
    %12 = arith.index_cast %11 : i32 to index
    %c0_2 = arith.constant 0 : index
    %13 = vector.load %arg2[%12, %c0_2] : memref<16x32xf32, #tpu.memory_space<vmem>>, vector<1x32xf32>
    %c0_i32_3 = arith.constant 0 : i32
    %14 = arith.addi %1, %c0_i32_3 : i32
    %c2_i32 = arith.constant 2 : i32
    %15 = arith.addi %14, %c2_i32 : i32
    %16 = arith.index_cast %15 : i32 to index
    %17 = memref.load %arg1[%16] : memref<32xi32, #tpu.memory_space<smem>>
    %18 = arith.index_cast %17 : i32 to index
    %c0_4 = arith.constant 0 : index
    %19 = vector.load %arg2[%18, %c0_4] : memref<16x32xf32, #tpu.memory_space<vmem>>, vector<1x32xf32>
    %c0_i32_5 = arith.constant 0 : i32
    %20 = arith.addi %1, %c0_i32_5 : i32
    %c3_i32 = arith.constant 3 : i32
    %21 = arith.addi %20, %c3_i32 : i32
    %22 = arith.index_cast %21 : i32 to index
    %23 = memref.load %arg1[%22] : memref<32xi32, #tpu.memory_space<smem>>
    %24 = arith.index_cast %23 : i32 to index
    %c0_6 = arith.constant 0 : index
    %25 = vector.load %arg2[%24, %c0_6] : memref<16x32xf32, #tpu.memory_space<vmem>>, vector<1x32xf32>
    %26 = tpu.concatenate %7, %13, %19, %25 in 1 : vector<1x32xf32>, vector<1x32xf32>, vector<1x32xf32>, vector<1x32xf32> -> vector<1x128xf32>
    %c0_7 = arith.constant 0 : index
    %c0_8 = arith.constant 0 : index
    %27 = vector.load %arg3[%c0_7, %c0_8] : memref<8x128xf32, #tpu.memory_space<vmem>>, vector<1x128xf32>
    tpu.vector_store %arg3[%c0_7, %c0_8], %26 {strides = array<i32>} : memref<8x128xf32, #tpu.memory_space<vmem>>, vector<1x128xf32>,
    %c4_i32_9 = arith.constant 4 : i32
    %28 = arith.addi %1, %c4_i32_9 : i32
    %c0_i32_10 = arith.constant 0 : i32
    %29 = arith.addi %28, %c0_i32_10 : i32
    %30 = arith.index_cast %29 : i32 to index
    %31 = memref.load %arg1[%30] : memref<32xi32, #tpu.memory_space<smem>>
    %32 = arith.index_cast %31 : i32 to index
    %c0_11 = arith.constant 0 : index
    %33 = vector.load %arg2[%32, %c0_11] : memref<16x32xf32, #tpu.memory_space<vmem>>, vector<1x32xf32>
    %c4_i32_12 = arith.constant 4 : i32
    %34 = arith.addi %1, %c4_i32_12 : i32
    %c1_i32_13 = arith.constant 1 : i32
    %35 = arith.addi %34, %c1_i32_13 : i32
    %36 = arith.index_cast %35 : i32 to index
    %37 = memref.load %arg1[%36] : memref<32xi32, #tpu.memory_space<smem>>
    %38 = arith.index_cast %37 : i32 to index
    %c0_14 = arith.constant 0 : index
    %39 = vector.load %arg2[%38, %c0_14] : memref<16x32xf32, #tpu.memory_space<vmem>>, vector<1x32xf32>
    %c4_i32_15 = arith.constant 4 : i32
    %40 = arith.addi %1, %c4_i32_15 : i32
    %c2_i32_16 = arith.constant 2 : i32
    %41 = arith.addi %40, %c2_i32_16 : i32
    %42 = arith.index_cast %41 : i32 to index
    %43 = memref.load %arg1[%42] : memref<32xi32, #tpu.memory_space<smem>>
    %44 = arith.index_cast %43 : i32 to index
    %c0_17 = arith.constant 0 : index
    %45 = vector.load %arg2[%44, %c0_17] : memref<16x32xf32, #tpu.memory_space<vmem>>, vector<1x32xf32>
    %c4_i32_18 = arith.constant 4 : i32
    %46 = arith.addi %1, %c4_i32_18 : i32
    %c3_i32_19 = arith.constant 3 : i32
    %47 = arith.addi %46, %c3_i32_19 : i32
    %48 = arith.index_cast %47 : i32 to index
    %49 = memref.load %arg1[%48] : memref<32xi32, #tpu.memory_space<smem>>
    %50 = arith.index_cast %49 : i32 to index
    %c0_20 = arith.constant 0 : index
    %51 = vector.load %arg2[%50, %c0_20] : memref<16x32xf32, #tpu.memory_space<vmem>>, vector<1x32xf32>
    %52 = tpu.concatenate %33, %39, %45, %51 in 1 : vector<1x32xf32>, vector<1x32xf32>, vector<1x32xf32>, vector<1x32xf32> -> vector<1x128xf32>
    %c1 = arith.constant 1 : index
    %c0_21 = arith.constant 0 : index
    %53 = vector.load %arg3[%c1, %c0_21] : memref<8x128xf32, #tpu.memory_space<vmem>>, vector<1x128xf32>
    tpu.vector_store %arg3[%c1, %c0_21], %52 {strides = array<i32>} : memref<8x128xf32, #tpu.memory_space<vmem>>, vector<1x128xf32>,
    %c8_i32_22 = arith.constant 8 : i32
    %54 = arith.addi %1, %c8_i32_22 : i32
    %c0_i32_23 = arith.constant 0 : i32
    %55 = arith.addi %54, %c0_i32_23 : i32
    %56 = arith.index_cast %55 : i32 to index
    %57 = memref.load %arg1[%56] : memref<32xi32, #tpu.memory_space<smem>>
    %58 = arith.index_cast %57 : i32 to index
    %c0_24 = arith.constant 0 : index
    %59 = vector.load %arg2[%58, %c0_24] : memref<16x32xf32, #tpu.memory_space<vmem>>, vector<1x32xf32>
    %c8_i32_25 = arith.constant 8 : i32
    %60 = arith.addi %1, %c8_i32_25 : i32
    %c1_i32_26 = arith.constant 1 : i32
    %61 = arith.addi %60, %c1_i32_26 : i32
    %62 = arith.index_cast %61 : i32 to index
    %63 = memref.load %arg1[%62] : memref<32xi32, #tpu.memory_space<smem>>
    %64 = arith.index_cast %63 : i32 to index
    %c0_27 = arith.constant 0 : index
    %65 = vector.load %arg2[%64, %c0_27] : memref<16x32xf32, #tpu.memory_space<vmem>>, vector<1x32xf32>
    %c8_i32_28 = arith.constant 8 : i32
    %66 = arith.addi %1, %c8_i32_28 : i32
    %c2_i32_29 = arith.constant 2 : i32
    %67 = arith.addi %66, %c2_i32_29 : i32
    %68 = arith.index_cast %67 : i32 to index
    %69 = memref.load %arg1[%68] : memref<32xi32, #tpu.memory_space<smem>>
    %70 = arith.index_cast %69 : i32 to index
    %c0_30 = arith.constant 0 : index
    %71 = vector.load %arg2[%70, %c0_30] : memref<16x32xf32, #tpu.memory_space<vmem>>, vector<1x32xf32>
    %c8_i32_31 = arith.constant 8 : i32
    %72 = arith.addi %1, %c8_i32_31 : i32
    %c3_i32_32 = arith.constant 3 : i32
    %73 = arith.addi %72, %c3_i32_32 : i32
    %74 = arith.index_cast %73 : i32 to index
    %75 = memref.load %arg1[%74] : memref<32xi32, #tpu.memory_space<smem>>
    %76 = arith.index_cast %75 : i32 to index
    %c0_33 = arith.constant 0 : index
    %77 = vector.load %arg2[%76, %c0_33] : memref<16x32xf32, #tpu.memory_space<vmem>>, vector<1x32xf32>
    %78 = tpu.concatenate %59, %65, %71, %77 in 1 : vector<1x32xf32>, vector<1x32xf32>, vector<1x32xf32>, vector<1x32xf32> -> vector<1x128xf32>
    %c2 = arith.constant 2 : index
    %c0_34 = arith.constant 0 : index
    %79 = vector.load %arg3[%c2, %c0_34] : memref<8x128xf32, #tpu.memory_space<vmem>>, vector<1x128xf32>
    tpu.vector_store %arg3[%c2, %c0_34], %78 {strides = array<i32>} : memref<8x128xf32, #tpu.memory_space<vmem>>, vector<1x128xf32>,
    %c12_i32 = arith.constant 12 : i32
    %80 = arith.addi %1, %c12_i32 : i32
    %c0_i32_35 = arith.constant 0 : i32
    %81 = arith.addi %80, %c0_i32_35 : i32
    %82 = arith.index_cast %81 : i32 to index
    %83 = memref.load %arg1[%82] : memref<32xi32, #tpu.memory_space<smem>>
    %84 = arith.index_cast %83 : i32 to index
    %c0_36 = arith.constant 0 : index
    %85 = vector.load %arg2[%84, %c0_36] : memref<16x32xf32, #tpu.memory_space<vmem>>, vector<1x32xf32>
    %c12_i32_37 = arith.constant 12 : i32
    %86 = arith.addi %1, %c12_i32_37 : i32
    %c1_i32_38 = arith.constant 1 : i32
    %87 = arith.addi %86, %c1_i32_38 : i32
    %88 = arith.index_cast %87 : i32 to index
    %89 = memref.load %arg1[%88] : memref<32xi32, #tpu.memory_space<smem>>
    %90 = arith.index_cast %89 : i32 to index
    %c0_39 = arith.constant 0 : index
    %91 = vector.load %arg2[%90, %c0_39] : memref<16x32xf32, #tpu.memory_space<vmem>>, vector<1x32xf32>
    %c12_i32_40 = arith.constant 12 : i32
    %92 = arith.addi %1, %c12_i32_40 : i32
    %c2_i32_41 = arith.constant 2 : i32
    %93 = arith.addi %92, %c2_i32_41 : i32
    %94 = arith.index_cast %93 : i32 to index
    %95 = memref.load %arg1[%94] : memref<32xi32, #tpu.memory_space<smem>>
    %96 = arith.index_cast %95 : i32 to index
    %c0_42 = arith.constant 0 : index
    %97 = vector.load %arg2[%96, %c0_42] : memref<16x32xf32, #tpu.memory_space<vmem>>, vector<1x32xf32>
    %c12_i32_43 = arith.constant 12 : i32
    %98 = arith.addi %1, %c12_i32_43 : i32
    %c3_i32_44 = arith.constant 3 : i32
    %99 = arith.addi %98, %c3_i32_44 : i32
    %100 = arith.index_cast %99 : i32 to index
    %101 = memref.load %arg1[%100] : memref<32xi32, #tpu.memory_space<smem>>
    %102 = arith.index_cast %101 : i32 to index
    %c0_45 = arith.constant 0 : index
    %103 = vector.load %arg2[%102, %c0_45] : memref<16x32xf32, #tpu.memory_space<vmem>>, vector<1x32xf32>
    %104 = tpu.concatenate %85, %91, %97, %103 in 1 : vector<1x32xf32>, vector<1x32xf32>, vector<1x32xf32>, vector<1x32xf32> -> vector<1x128xf32>
    %c3 = arith.constant 3 : index
    %c0_46 = arith.constant 0 : index
    %105 = vector.load %arg3[%c3, %c0_46] : memref<8x128xf32, #tpu.memory_space<vmem>>, vector<1x128xf32>
    tpu.vector_store %arg3[%c3, %c0_46], %104 {strides = array<i32>} : memref<8x128xf32, #tpu.memory_space<vmem>>, vector<1x128xf32>,
    %c16_i32 = arith.constant 16 : i32
    %106 = arith.addi %1, %c16_i32 : i32
    %c0_i32_47 = arith.constant 0 : i32
    %107 = arith.addi %106, %c0_i32_47 : i32
    %108 = arith.index_cast %107 : i32 to index
    %109 = memref.load %arg1[%108] : memref<32xi32, #tpu.memory_space<smem>>
    %110 = arith.index_cast %109 : i32 to index
    %c0_48 = arith.constant 0 : index
    %111 = vector.load %arg2[%110, %c0_48] : memref<16x32xf32, #tpu.memory_space<vmem>>, vector<1x32xf32>
    %c16_i32_49 = arith.constant 16 : i32
    %112 = arith.addi %1, %c16_i32_49 : i32
    %c1_i32_50 = arith.constant 1 : i32
    %113 = arith.addi %112, %c1_i32_50 : i32
    %114 = arith.index_cast %113 : i32 to index
    %115 = memref.load %arg1[%114] : memref<32xi32, #tpu.memory_space<smem>>
    %116 = arith.index_cast %115 : i32 to index
    %c0_51 = arith.constant 0 : index
    %117 = vector.load %arg2[%116, %c0_51] : memref<16x32xf32, #tpu.memory_space<vmem>>, vector<1x32xf32>
    %c16_i32_52 = arith.constant 16 : i32
    %118 = arith.addi %1, %c16_i32_52 : i32
    %c2_i32_53 = arith.constant 2 : i32
    %119 = arith.addi %118, %c2_i32_53 : i32
    %120 = arith.index_cast %119 : i32 to index
    %121 = memref.load %arg1[%120] : memref<32xi32, #tpu.memory_space<smem>>
    %122 = arith.index_cast %121 : i32 to index
    %c0_54 = arith.constant 0 : index
    %123 = vector.load %arg2[%122, %c0_54] : memref<16x32xf32, #tpu.memory_space<vmem>>, vector<1x32xf32>
    %c16_i32_55 = arith.constant 16 : i32
    %124 = arith.addi %1, %c16_i32_55 : i32
    %c3_i32_56 = arith.constant 3 : i32
    %125 = arith.addi %124, %c3_i32_56 : i32
    %126 = arith.index_cast %125 : i32 to index
    %127 = memref.load %arg1[%126] : memref<32xi32, #tpu.memory_space<smem>>
    %128 = arith.index_cast %127 : i32 to index
    %c0_57 = arith.constant 0 : index
    %129 = vector.load %arg2[%128, %c0_57] : memref<16x32xf32, #tpu.memory_space<vmem>>, vector<1x32xf32>
    %130 = tpu.concatenate %111, %117, %123, %129 in 1 : vector<1x32xf32>, vector<1x32xf32>, vector<1x32xf32>, vector<1x32xf32> -> vector<1x128xf32>
    %c4 = arith.constant 4 : index
    %c0_58 = arith.constant 0 : index
    %131 = vector.load %arg3[%c4, %c0_58] : memref<8x128xf32, #tpu.memory_space<vmem>>, vector<1x128xf32>
    tpu.vector_store %arg3[%c4, %c0_58], %130 {strides = array<i32>} : memref<8x128xf32, #tpu.memory_space<vmem>>, vector<1x128xf32>,
    %c20_i32 = arith.constant 20 : i32
    %132 = arith.addi %1, %c20_i32 : i32
    %c0_i32_59 = arith.constant 0 : i32
    %133 = arith.addi %132, %c0_i32_59 : i32
    %134 = arith.index_cast %133 : i32 to index
    %135 = memref.load %arg1[%134] : memref<32xi32, #tpu.memory_space<smem>>
    %136 = arith.index_cast %135 : i32 to index
    %c0_60 = arith.constant 0 : index
    %137 = vector.load %arg2[%136, %c0_60] : memref<16x32xf32, #tpu.memory_space<vmem>>, vector<1x32xf32>
    %c20_i32_61 = arith.constant 20 : i32
    %138 = arith.addi %1, %c20_i32_61 : i32
    %c1_i32_62 = arith.constant 1 : i32
    %139 = arith.addi %138, %c1_i32_62 : i32
    %140 = arith.index_cast %139 : i32 to index
    %141 = memref.load %arg1[%140] : memref<32xi32, #tpu.memory_space<smem>>
    %142 = arith.index_cast %141 : i32 to index
    %c0_63 = arith.constant 0 : index
    %143 = vector.load %arg2[%142, %c0_63] : memref<16x32xf32, #tpu.memory_space<vmem>>, vector<1x32xf32>
    %c20_i32_64 = arith.constant 20 : i32
    %144 = arith.addi %1, %c20_i32_64 : i32
    %c2_i32_65 = arith.constant 2 : i32
    %145 = arith.addi %144, %c2_i32_65 : i32
    %146 = arith.index_cast %145 : i32 to index
    %147 = memref.load %arg1[%146] : memref<32xi32, #tpu.memory_space<smem>>
    %148 = arith.index_cast %147 : i32 to index
    %c0_66 = arith.constant 0 : index
    %149 = vector.load %arg2[%148, %c0_66] : memref<16x32xf32, #tpu.memory_space<vmem>>, vector<1x32xf32>
    %c20_i32_67 = arith.constant 20 : i32
    %150 = arith.addi %1, %c20_i32_67 : i32
    %c3_i32_68 = arith.constant 3 : i32
    %151 = arith.addi %150, %c3_i32_68 : i32
    %152 = arith.index_cast %151 : i32 to index
    %153 = memref.load %arg1[%152] : memref<32xi32, #tpu.memory_space<smem>>
    %154 = arith.index_cast %153 : i32 to index
    %c0_69 = arith.constant 0 : index
    %155 = vector.load %arg2[%154, %c0_69] : memref<16x32xf32, #tpu.memory_space<vmem>>, vector<1x32xf32>
    %156 = tpu.concatenate %137, %143, %149, %155 in 1 : vector<1x32xf32>, vector<1x32xf32>, vector<1x32xf32>, vector<1x32xf32> -> vector<1x128xf32>
    %c5 = arith.constant 5 : index
    %c0_70 = arith.constant 0 : index
    %157 = vector.load %arg3[%c5, %c0_70] : memref<8x128xf32, #tpu.memory_space<vmem>>, vector<1x128xf32>
    tpu.vector_store %arg3[%c5, %c0_70], %156 {strides = array<i32>} : memref<8x128xf32, #tpu.memory_space<vmem>>, vector<1x128xf32>,
    %c24_i32 = arith.constant 24 : i32
    %158 = arith.addi %1, %c24_i32 : i32
    %c0_i32_71 = arith.constant 0 : i32
    %159 = arith.addi %158, %c0_i32_71 : i32
    %160 = arith.index_cast %159 : i32 to index
    %161 = memref.load %arg1[%160] : memref<32xi32, #tpu.memory_space<smem>>
    %162 = arith.index_cast %161 : i32 to index
    %c0_72 = arith.constant 0 : index
    %163 = vector.load %arg2[%162, %c0_72] : memref<16x32xf32, #tpu.memory_space<vmem>>, vector<1x32xf32>
    %c24_i32_73 = arith.constant 24 : i32
    %164 = arith.addi %1, %c24_i32_73 : i32
    %c1_i32_74 = arith.constant 1 : i32
    %165 = arith.addi %164, %c1_i32_74 : i32
    %166 = arith.index_cast %165 : i32 to index
    %167 = memref.load %arg1[%166] : memref<32xi32, #tpu.memory_space<smem>>
    %168 = arith.index_cast %167 : i32 to index
    %c0_75 = arith.constant 0 : index
    %169 = vector.load %arg2[%168, %c0_75] : memref<16x32xf32, #tpu.memory_space<vmem>>, vector<1x32xf32>
    %c24_i32_76 = arith.constant 24 : i32
    %170 = arith.addi %1, %c24_i32_76 : i32
    %c2_i32_77 = arith.constant 2 : i32
    %171 = arith.addi %170, %c2_i32_77 : i32
    %172 = arith.index_cast %171 : i32 to index
    %173 = memref.load %arg1[%172] : memref<32xi32, #tpu.memory_space<smem>>
    %174 = arith.index_cast %173 : i32 to index
    %c0_78 = arith.constant 0 : index
    %175 = vector.load %arg2[%174, %c0_78] : memref<16x32xf32, #tpu.memory_space<vmem>>, vector<1x32xf32>
    %c24_i32_79 = arith.constant 24 : i32
    %176 = arith.addi %1, %c24_i32_79 : i32
    %c3_i32_80 = arith.constant 3 : i32
    %177 = arith.addi %176, %c3_i32_80 : i32
    %178 = arith.index_cast %177 : i32 to index
    %179 = memref.load %arg1[%178] : memref<32xi32, #tpu.memory_space<smem>>
    %180 = arith.index_cast %179 : i32 to index
    %c0_81 = arith.constant 0 : index
    %181 = vector.load %arg2[%180, %c0_81] : memref<16x32xf32, #tpu.memory_space<vmem>>, vector<1x32xf32>
    %182 = tpu.concatenate %163, %169, %175, %181 in 1 : vector<1x32xf32>, vector<1x32xf32>, vector<1x32xf32>, vector<1x32xf32> -> vector<1x128xf32>
    %c6 = arith.constant 6 : index
    %c0_82 = arith.constant 0 : index
    %183 = vector.load %arg3[%c6, %c0_82] : memref<8x128xf32, #tpu.memory_space<vmem>>, vector<1x128xf32>
    tpu.vector_store %arg3[%c6, %c0_82], %182 {strides = array<i32>} : memref<8x128xf32, #tpu.memory_space<vmem>>, vector<1x128xf32>,
    %c28_i32 = arith.constant 28 : i32
    %184 = arith.addi %1, %c28_i32 : i32
    %c0_i32_83 = arith.constant 0 : i32
    %185 = arith.addi %184, %c0_i32_83 : i32
    %186 = arith.index_cast %185 : i32 to index
    %187 = memref.load %arg1[%186] : memref<32xi32, #tpu.memory_space<smem>>
    %188 = arith.index_cast %187 : i32 to index
    %c0_84 = arith.constant 0 : index
    %189 = vector.load %arg2[%188, %c0_84] : memref<16x32xf32, #tpu.memory_space<vmem>>, vector<1x32xf32>
    %c28_i32_85 = arith.constant 28 : i32
    %190 = arith.addi %1, %c28_i32_85 : i32
    %c1_i32_86 = arith.constant 1 : i32
    %191 = arith.addi %190, %c1_i32_86 : i32
    %192 = arith.index_cast %191 : i32 to index
    %193 = memref.load %arg1[%192] : memref<32xi32, #tpu.memory_space<smem>>
    %194 = arith.index_cast %193 : i32 to index
    %c0_87 = arith.constant 0 : index
    %195 = vector.load %arg2[%194, %c0_87] : memref<16x32xf32, #tpu.memory_space<vmem>>, vector<1x32xf32>
    %c28_i32_88 = arith.constant 28 : i32
    %196 = arith.addi %1, %c28_i32_88 : i32
    %c2_i32_89 = arith.constant 2 : i32
    %197 = arith.addi %196, %c2_i32_89 : i32
    %198 = arith.index_cast %197 : i32 to index
    %199 = memref.load %arg1[%198] : memref<32xi32, #tpu.memory_space<smem>>
    %200 = arith.index_cast %199 : i32 to index
    %c0_90 = arith.constant 0 : index
    %201 = vector.load %arg2[%200, %c0_90] : memref<16x32xf32, #tpu.memory_space<vmem>>, vector<1x32xf32>
    %c28_i32_91 = arith.constant 28 : i32
    %202 = arith.addi %1, %c28_i32_91 : i32
    %c3_i32_92 = arith.constant 3 : i32
    %203 = arith.addi %202, %c3_i32_92 : i32
    %204 = arith.index_cast %203 : i32 to index
    %205 = memref.load %arg1[%204] : memref<32xi32, #tpu.memory_space<smem>>
    %206 = arith.index_cast %205 : i32 to index
    %c0_93 = arith.constant 0 : index
    %207 = vector.load %arg2[%206, %c0_93] : memref<16x32xf32, #tpu.memory_space<vmem>>, vector<1x32xf32>
    %208 = tpu.concatenate %189, %195, %201, %207 in 1 : vector<1x32xf32>, vector<1x32xf32>, vector<1x32xf32>, vector<1x32xf32> -> vector<1x128xf32>
    %c7 = arith.constant 7 : index
    %c0_94 = arith.constant 0 : index
    %209 = vector.load %arg3[%c7, %c0_94] : memref<8x128xf32, #tpu.memory_space<vmem>>, vector<1x128xf32>
    tpu.vector_store %arg3[%c7, %c0_94], %208 {strides = array<i32>} : memref<8x128xf32, #tpu.memory_space<vmem>>, vector<1x128xf32>,
    return
  }
  func.func @transform_0(%arg0: i32, %arg1: memref<32xi32, #tpu.memory_space<smem>>) -> (i32, i32) {
    %c0_i32 = arith.constant 0 : i32
    %c0_i32_0 = arith.constant 0 : i32
    %c0_i32_1 = arith.constant 0 : i32
    return %c0_i32, %c0_i32_0 : i32, i32
  }
  func.func @transform_1(%arg0: i32, %arg1: memref<32xi32, #tpu.memory_space<smem>>) -> (i32, i32) {
    %c0_i32 = arith.constant 0 : i32
    %c0_i32_0 = arith.constant 0 : i32
    return %arg0, %c0_i32 : i32, i32
  }
}

</mosaic_0001>

<bundles_post_ra>
// kernel: embedding_forward_full.1
= control target key start
LH: loop header
LB: loop body
LE: loop exit
PB: predicated region body
PF: predicated region fallthrough
CT: control target
= control target key end

     0   :  { %s543_s0 = inlined_call_operand.vmem [shape: s32[32], index: 0, kind: input, shape index: {}]   ;;  %s544_s1 = inlined_call_operand.vmem [shape: f32[16,32], index: 1, kind: input, shape index: {}]   ;;  %s545_s2 = inlined_call_operand.vmem [shape: f32[8,128], index: 2, kind: output, shape index: {}]  }
   0x1   :  { %s7_s11 = sshll.u32 %s543_s0, 4  ;;  %s8_s11 = int_to_ptr.vmem [resolvable:$true] %s7_s11 }
   0x2   :  { %s345_s12 = scalar_lea.vmem %s8_s11, 16  ;;  %p350_p1 = scmp.lt.s32.totalorder %s8_s11, %s8_s11 }
   0x3   :  { %p346_p0 = scmp.ne.s32.totalorder %s8_s11, %s345_s12  ;;  %p351_p2 = scmp.lt.s32.totalorder %s345_s12, %s345_s12 }
   0x5   :  { %p352_p3 = por %p351_p2, %p350_p1 }
   0x7   :  { %p353_p4 = pnand %p352_p3, %p346_p0 }
   0x9   :  { %356 = shalt.err (!%p353_p4)  }
   0xa   :  { %s359_s13 = smov [#allocation3]  }
   0xb   :  { %10 = dma.vmem_to_smem %s8_s11, 16, %s359_s13, [#allocation2] }
   0xc   :  { %357 = dma.done.wait [#allocation2], 16 }
   0xd   :  { %358 = vsyncadd [#allocation2], 4294967280 }
   0xe   :  { %12 = sfence }
   0xf   :  { %s318_s14 = sld [smem:[#allocation3 + $0x9]]  ;;  %s322_s16 = sld [smem:[#allocation3 + $0xd]]  ;;  %vm43_vm0 = vcmask 261120   ;;  %vm45_vm1 = vcmask 523264   ;;  %vm47_vm2 = vcmask 785408  }
  0x10   :  { %s310_s15 = sld [smem:[#allocation3 + $0x1]]  ;;  %s314_s17 = sld [smem:[#allocation3 + $0x5]] }
  0x11   :  { %s330_s18 = sld [smem:[#allocation3 + $0x15]]  ;;  %s326_s19 = sld [smem:[#allocation3 + $0x11]] }
  0x12   :  { %s338_s0 = sld [smem:[#allocation3 + $0x1d]]  ;;  %s334_s23 = sld [smem:[#allocation3 + $0x19]] }
  0x13   :  { %s360_s30 = smov 32   ;;  %s315_s9 = sld [smem:[#allocation3 + $0x6]] }
  0x14   :  { %s311_s13 = sld [smem:[#allocation3 + $0x2]]  ;;  %s361_s10 = smov 64  }
  0x15   :  { %s88_s22 = scalar_lea.vmem %s544_s1, %s318_s14  ;;  %s120_s29 = scalar_lea.vmem %s544_s1, %s322_s16 }
  0x16   :  { %v89_v0 = vld [vmem:[%s88_s22] sm:$0x1]  ;;  %s21_s26 = scalar_lea.vmem %s544_s1, %s310_s15  ;;  %s56_s5 = scalar_lea.vmem %s544_s1, %s314_s17 }
  0x17   :  { %99 = vrot.lane.b32.xlu1 %v89_v0, %s360_s30  ;;  %v22_v1 = vld [vmem:[%s21_s26] sm:$0x1]  ;;  %s184_s8 = scalar_lea.vmem %s544_s1, %s330_s18  ;;  %s152_s12 = scalar_lea.vmem %s544_s1, %s326_s19 }
  0x18   :  { %32 = vrot.lane.b32.xlu0 %v22_v1, %s360_s30  ;;  %v121_v2 = vld [vmem:[%s120_s29] sm:$0x1]  ;;  %s248_s16 = scalar_lea.vmem %s544_s1, %s338_s0  ;;  %s323_s17 = sld [smem:[#allocation3 + $0xe]] }
  0x19   :  { %v57_v3 = vld [vmem:[%s56_s5] sm:$0x1]  ;;  %s216_s22 = scalar_lea.vmem %s544_s1, %s334_s23  ;;  %s319_s18 = sld [smem:[#allocation3 + $0xa]] }
  0x1a   :  { %v185_v4 = vld [vmem:[%s184_s8] sm:$0x1]  ;;  %s60_s25 = scalar_lea.vmem %s544_s1, %s315_s9  ;;  %s331_s26 = sld [smem:[#allocation3 + $0x16]] }
  0x1b   :  { %131 = vrot.lane.b32.xlu1 %v121_v2, %s360_s30  ;;  %v153_v5 = vld [vmem:[%s152_s12] sm:$0x1]  ;;  %s25_s29 = scalar_lea.vmem %s544_s1, %s311_s13  ;;  %s327_s0 = sld [smem:[#allocation3 + $0x12]] }
  0x1c   :  { %67 = vrot.lane.b32.xlu0 %v57_v3, %s360_s30  ;;  %v249_v6 = vld [vmem:[%s248_s16] sm:$0x1]  ;;  %s339_s5 = sld [smem:[#allocation3 + $0x1e]]  ;;  %s335_s9 = sld [smem:[#allocation3 + $0x1a]] }
  0x1d   :  { %v217_v7 = vld [vmem:[%s216_s22] sm:$0x1]  ;;  %s316_s13 = sld [smem:[#allocation3 + $0x7]]  ;;  %s362_s14 = smov 96  }
  0x1e   :  { %v61_v8 = vld [vmem:[%s60_s25] sm:$0x1]  ;;  %s124_s4 = scalar_lea.vmem %s544_s1, %s323_s17  ;;  %s312_s17 = sld [smem:[#allocation3 + $0x3]] }
  0x1f   :  { %195 = vrot.lane.b32.xlu1 %v185_v4, %s360_s30  ;;  %v26_v9 = vld [vmem:[%s25_s29] sm:$0x1]  ;;  %s92_s8 = scalar_lea.vmem %s544_s1, %s319_s18  ;;  %s324_s18 = sld [smem:[#allocation3 + $0xf]] }
  0x20   :  { %163 = vrot.lane.b32.xlu0 %v153_v5, %s360_s30  ;;  %v125_v10 = vld [vmem:[%s124_s4] sm:$0x1]  ;;  %s313_s27 = sld [smem:[#allocation3 + $0x4]]  ;;  %s16_s28 = sld [smem:[#allocation3]] }
  0x21   :  { %v93_v11 = vld [vmem:[%s92_s8] sm:$0x1]  ;;  %s156_s16 = scalar_lea.vmem %s544_s1, %s327_s0  ;;  %s332_s0 = sld [smem:[#allocation3 + $0x17]] }
  0x22   :  { %v157_v13 = vld [vmem:[%s156_s16] sm:$0x1]  ;;  %s252_s22 = scalar_lea.vmem %s544_s1, %s339_s5  ;;  %s220_s25 = scalar_lea.vmem %s544_s1, %s335_s9 }
  0x23   :  { %259 = vrot.lane.b32.xlu1 %v249_v6, %s360_s30  ;;  %v253_v14 = vld [vmem:[%s252_s22] sm:$0x1]  ;;  %s64_s29 = scalar_lea.vmem %s544_s1, %s316_s13  ;;  %s328_s5 = sld [smem:[#allocation3 + $0x13]] }
  0x24   :  { %227 = vrot.lane.b32.xlu0 %v217_v7, %s360_s30  ;;  %s188_s30 = scalar_lea.vmem %s544_s1, %s331_s26  ;;  %s320_s26 = sld [smem:[#allocation3 + $0xb]]  ;;  %v221_v15 = vld [vmem:[%s220_s25] sm:$0x1] }
  0x25   :  { %v189_v12 = vld [vmem:[%s188_s30] sm:$0x1]  ;;  %s29_s4 = scalar_lea.vmem %s544_s1, %s312_s17  ;;  %s128_s8 = scalar_lea.vmem %s544_s1, %s324_s18 }
  0x26   :  { %v65_v16 = vld [vmem:[%s64_s29] sm:$0x1]  ;;  %s340_s9 = sld [smem:[#allocation3 + $0x1f]]  ;;  %s336_s13 = sld [smem:[#allocation3 + $0x1b]] }
  0x27   :  { %71 = vrot.lane.b32.xlu1 %v61_v8, %s361_s10  ;;  %v30_v17 = vld [vmem:[%s29_s4] sm:$0x1]  ;;  %s321_s29 = sld [smem:[#allocation3 + $0xc]]  ;;  %s52_s4 = scalar_lea.vmem %s544_s1, %s313_s27 }
  0x28   :  { %36 = vrot.lane.b32.xlu0 %v26_v9, %s361_s10  ;;  %v129_v18 = vld [vmem:[%s128_s8] sm:$0x1]  ;;  %s17_s8 = scalar_lea.vmem %s544_s1, %s16_s28 }
  0x29   :  { %s160_s21 = scalar_lea.vmem %s544_s1, %s328_s5  ;;  %s460_s5 = sld [smem:[#allocation3 + $0x14]]  ;;  %v53_v38 = vld [vmem:[%s52_s4] sm:$0x1] }
  0x2a   :  { %s96_s30 = scalar_lea.vmem %s544_s1, %s320_s26  ;;  %v161_v21 = vld [vmem:[%s160_s21] sm:$0x1] }
  0x2b   :  { %135 = vrot.lane.b32.xlu1 %v125_v10, %s361_s10  ;;  %v97_v19 = vld [vmem:[%s96_s30] sm:$0x1] }
  0x2c   :  { %103 = vrot.lane.b32.xlu0 %v93_v11, %s361_s10  ;;  %s256_s19 = scalar_lea.vmem %s544_s1, %s340_s9  ;;  %s224_s26 = scalar_lea.vmem %s544_s1, %s336_s13  ;;  %v18_v40 = vld [vmem:[%s17_s8] sm:$0x1] }
  0x2d   :  { %v257_v22 = vld [vmem:[%s256_s19] sm:$0x1]  ;;  %s465_s9 = sld [smem:[#allocation3 + $0x10]]  ;;  %s116_s30 = scalar_lea.vmem %s544_s1, %s321_s29 }
  0x2e   :  { %v225_v23 = vld [vmem:[%s224_s26] sm:$0x1]  ;;  %s470_s13 = sld [smem:[#allocation3 + $0x1c]] }
  0x2f   :  { %199 = vrot.lane.b32.xlu1 %v189_v12, %s361_s10  ;;  %v117_v44 = vld [vmem:[%s116_s30] sm:$0x1]  ;;  %s180_s21 = scalar_lea.vmem %s544_s1, %s460_s5 }
  0x30   :  { %167 = vrot.lane.b32.xlu0 %v157_v13, %s361_s10  ;;  %v181_v54 = vld [vmem:[%s180_s21] sm:$0x1] }
  0x33   :  { %263 = vrot.lane.b32.xlu1 %v253_v14, %s361_s10  ;;  %s148_s19 = scalar_lea.vmem %s544_s1, %s465_s9 }
  0x34   :  { %231 = vrot.lane.b32.xlu0 %v221_v15, %s361_s10  ;;  %s192_s10 = scalar_lea.vmem %s544_s1, %s332_s0  ;;  %s317_s0 = sld [smem:[#allocation3 + $0x8]]  ;;  %v149_v57 = vld [vmem:[%s148_s19] sm:$0x1] }
  0x35   :  { %v193_v20 = vld [vmem:[%s192_s10] sm:$0x1]  ;;  %s475_s10 = sld [smem:[#allocation3 + $0x18]] }
  0x37   :  { %75 = vrot.lane.b32.xlu1 %v65_v16, %s362_s14 }
  0x38   :  { %40 = vrot.lane.b32.xlu0 %v30_v17, %s362_s14 }
  0x3a   :  { %s84_s16 = scalar_lea.vmem %s544_s1, %s317_s0  ;;  %s244_s0 = scalar_lea.vmem %s544_s1, %s470_s13 }
  0x3b   :  { %139 = vrot.lane.b32.xlu1 %v129_v18, %s362_s14  ;;  %v85_v47 = vld [vmem:[%s84_s16] sm:$0x1]  ;;  %s212_s4 = scalar_lea.vmem %s544_s1, %s475_s10 }
  0x3c   :  { %107 = vrot.lane.b32.xlu0 %v97_v19, %s362_s14  ;;  %v245_v0 = vld [vmem:[%s244_s0] sm:$0x1] }
  0x3d   :  { %v213_v3 = vld [vmem:[%s212_s4] sm:$0x1] }
  0x3f   :  { %203 = vrot.lane.b32.xlu1 %v193_v20, %s362_s14 }
  0x40   :  { %171 = vrot.lane.b32.xlu0 %v161_v21, %s362_s14 }
  0x43   :  { %267 = vrot.lane.b32.xlu1 %v257_v22, %s362_s14 }
  0x44   :  { %235 = vrot.lane.b32.xlu0 %v225_v23, %s362_s14 }
  0x89   :  { %v100_v24 = vpop.permute.xlu1 %99 }
  0x8a   :  { %v33_v25 = vpop.permute.xlu0 %32  ;;  %v110_v53 = vsel %vm43_vm0, %v85_v47, %v100_v24 }
  0x8b   :  { %v44_v43 = vsel %vm43_vm0, %v18_v40, %v33_v25 }
  0x8d   :  { %v132_v26 = vpop.permute.xlu1 %131 }
  0x8e   :  { %v68_v27 = vpop.permute.xlu0 %67  ;;  %v142_v52 = vsel %vm43_vm0, %v117_v44, %v132_v26 }
  0x8f   :  { %v78_v42 = vsel %vm43_vm0, %v53_v38, %v68_v27 }
  0x91   :  { %v196_v28 = vpop.permute.xlu1 %195 }
  0x92   :  { %v164_v29 = vpop.permute.xlu0 %163  ;;  %v206_v62 = vsel %vm43_vm0, %v181_v54, %v196_v28 }
  0x93   :  { %v174_v63 = vsel %vm43_vm0, %v149_v57, %v164_v29 }
  0x95   :  { %v453_v30 = vpop.permute.xlu1 %259 }
  0x96   :  { %v455_v31 = vpop.permute.xlu0 %227  ;;  %v270_v8 = vsel %vm43_vm0, %v245_v0, %v453_v30 }
  0x97   :  { %v238_v9 = vsel %vm43_vm0, %v213_v3, %v455_v31 }
  0x99   :  { %v72_v32 = vpop.permute.xlu1 %71 }
  0x9a   :  { %v37_v33 = vpop.permute.xlu0 %36  ;;  %v79_v45 = vsel %vm45_vm1, %v78_v42, %v72_v32 }
  0x9b   :  { %v46_v48 = vsel %vm45_vm1, %v44_v43, %v37_v33 }
  0x9d   :  { %v136_v34 = vpop.permute.xlu1 %135 }
  0x9e   :  { %v104_v35 = vpop.permute.xlu0 %103  ;;  %v143_v55 = vsel %vm45_vm1, %v142_v52, %v136_v34 }
  0x9f   :  { %v111_v58 = vsel %vm45_vm1, %v110_v53, %v104_v35 }
  0xa1   :  { %v200_v36 = vpop.permute.xlu1 %199 }
  0xa2   :  { %v168_v37 = vpop.permute.xlu0 %167  ;;  %v207_v1 = vsel %vm45_vm1, %v206_v62, %v200_v36 }
  0xa3   :  { %v175_v4 = vsel %vm45_vm1, %v174_v63, %v168_v37 }
  0xa5   :  { %v264_v39 = vpop.permute.xlu1 %263 }
  0xa6   :  { %v232_v41 = vpop.permute.xlu0 %231  ;;  %v271_v10 = vsel %vm45_vm1, %v270_v8, %v264_v39 }
  0xa7   :  { %v239_v12 = vsel %vm45_vm1, %v238_v9, %v232_v41 }
  0xa9   :  { %v76_v46 = vpop.permute.xlu1 %75 }
  0xaa   :  { %v80_v49 = vsel %vm47_vm2, %v79_v45, %v76_v46  ;;  %v41_v50 = vpop.permute.xlu0 %40 }
  0xab   :  { %81 = vst [vmem:[%s545_s2 + $0x1] sm:$0x1] %v80_v49  ;;  %v48_v51 = vsel %vm47_vm2, %v46_v48, %v41_v50 }
  0xac   :  { %49 = vst [vmem:[%s545_s2] sm:$0x1] %v48_v51 }
  0xad   :  { %v140_v56 = vpop.permute.xlu1 %139 }
  0xae   :  { %v144_v59 = vsel %vm47_vm2, %v143_v55, %v140_v56  ;;  %v108_v60 = vpop.permute.xlu0 %107 }
  0xaf   :  { %145 = vst [vmem:[%s545_s2 + $0x3] sm:$0x1] %v144_v59  ;;  %v112_v61 = vsel %vm47_vm2, %v111_v58, %v108_v60 }
  0xb0   :  { %113 = vst [vmem:[%s545_s2 + $0x2] sm:$0x1] %v112_v61 }
  0xb1   :  { %v204_v2 = vpop.permute.xlu1 %203 }
  0xb2   :  { %v208_v5 = vsel %vm47_vm2, %v207_v1, %v204_v2  ;;  %v172_v6 = vpop.permute.xlu0 %171 }
  0xb3   :  { %209 = vst [vmem:[%s545_s2 + $0x5] sm:$0x1] %v208_v5  ;;  %v176_v7 = vsel %vm47_vm2, %v175_v4, %v172_v6 }
  0xb4   :  { %177 = vst [vmem:[%s545_s2 + $0x4] sm:$0x1] %v176_v7 }
  0xb5   :  { %v268_v11 = vpop.permute.xlu1 %267 }
  0xb6   :  { %v272_v13 = vsel %vm47_vm2, %v271_v10, %v268_v11  ;;  %v236_v14 = vpop.permute.xlu0 %235 }
  0xb7   :  { %273 = vst [vmem:[%s545_s2 + $0x7] sm:$0x1] %v272_v13  ;;  %v240_v15 = vsel %vm47_vm2, %v239_v12, %v236_v14 }
  0xb8   :  { %241 = vst [vmem:[%s545_s2 + $0x6] sm:$0x1] %v240_v15 }

</bundles_post_ra>
